<compile_context>
chip_gen: v7x
topology: tpu7x:2x2x1
jax: 0.10.0
libtpu: 0.0.40
codegen_flags: <defaults>
</compile_context>

<pallas_src>
import functools

import jax
import jax.numpy as jnp
from jax.experimental import pallas as pl
from jax.experimental.pallas import tpu as pltpu

_LANE = 128
_MAX_BATCH_TILE = 1024  # keep double-buffered x/out tiles tiny vs v7x's 64 MiB VMEM


def _round_up(x, m):
    return (x + m - 1) // m * m


def brain_forward_kernel(x_ref, w1_ref, b1_ref, w2_ref, b2_ref, w3_ref, b3_ref,
                         out_ref):
    x = x_ref[...]  # bf16 tile [tb, in_dim]

    # fc1 + relu  (bf16 x bf16 -> f32 accumulate on the MXU)
    h1 = jnp.dot(x, w1_ref[...], preferred_element_type=jnp.float32)
    h1 = jnp.maximum(h1 + b1_ref[...], 0.0)

    # fc2 + relu
    h2 = jnp.dot(h1.astype(jnp.bfloat16), w2_ref[...],
                 preferred_element_type=jnp.float32)
    h2 = jnp.maximum(h2 + b2_ref[...], 0.0)

    # fc3 (no activation); out block is lane-dense (padded to multiple of 128)
    out = jnp.dot(h2.astype(jnp.bfloat16), w3_ref[...],
                  preferred_element_type=jnp.float32)
    out_ref[...] = (out + b3_ref[...]).astype(out_ref.dtype)


def brain_forward(x, params):
    """Fused MLP forward pass as a single batch-tiled Pallas kernel."""
    w1, b1, w2, b2, w3, b3 = params
    batch, in_dim = x.shape
    hidden = w1.shape[1]
    out_dim = w3.shape[1]

    # ---- layout plumbing (wrapper side) ------------------------------------
    # Lane-dense output: zero-pad fc3 columns to a multiple of 128.
    out_pad = _round_up(out_dim, _LANE)
    if out_pad != out_dim:
        w3 = jnp.pad(w3, ((0, 0), (0, out_pad - out_dim)))
        b3 = jnp.pad(b3, ((0, 0), (0, out_pad - out_dim)))

    # bf16 MXU operands; f32 biases (bias-add / ReLU stay in f32).
    x_bf = x.astype(jnp.bfloat16)
    w1_bf = w1.astype(jnp.bfloat16)
    w2_bf = w2.astype(jnp.bfloat16)
    w3_bf = w3.astype(jnp.bfloat16)
    b1 = b1.astype(jnp.float32)
    b2 = b2.astype(jnp.float32)
    b3 = b3.astype(jnp.float32)

    # ---- batch tiling --------------------------------------------------------
    if batch <= _MAX_BATCH_TILE:
        tb = batch                      # single grid step, full-batch block
        batch_p = batch
    else:
        tb = _MAX_BATCH_TILE            # multiple of 8 sublanes
        batch_p = _round_up(batch, tb)
        if batch_p != batch:
            x_bf = jnp.pad(x_bf, ((0, batch_p - batch), (0, 0)))
    grid = (batch_p // tb,)

    flops = 2 * batch_p * (in_dim * hidden + hidden * hidden + hidden * out_pad)
    bytes_accessed = (batch_p * in_dim * 2                       # x (bf16)
                      + (w1_bf.size + w2_bf.size + w3_bf.size) * 2
                      + (b1.size + b2.size + b3.size) * 4
                      + batch_p * out_pad * 4)                   # out (f32)

    out = pl.pallas_call(
        brain_forward_kernel,
        out_shape=jax.ShapeDtypeStruct((batch_p, out_pad), jnp.float32),
        grid_spec=pltpu.PrefetchScalarGridSpec(
            num_scalar_prefetch=0,
            grid=grid,
            in_specs=[
                pl.BlockSpec((tb, in_dim), lambda i: (i, 0)),       # x tile
                pl.BlockSpec((in_dim, hidden), lambda i: (0, 0)),   # w1 (VMEM-resident)
                pl.BlockSpec((1, hidden), lambda i: (0, 0)),        # b1
                pl.BlockSpec((hidden, hidden), lambda i: (0, 0)),   # w2
                pl.BlockSpec((1, hidden), lambda i: (0, 0)),        # b2
                pl.BlockSpec((hidden, out_pad), lambda i: (0, 0)),  # w3 (padded)
                pl.BlockSpec((1, out_pad), lambda i: (0, 0)),       # b3 (padded)
            ],
            out_specs=pl.BlockSpec((tb, out_pad), lambda i: (i, 0)),
        ),
        compiler_params=pltpu.CompilerParams(
            dimension_semantics=("parallel",),   # v7x: shard batch across both TCs
            vmem_limit_bytes=32 << 20,           # explicit (v5e default scoped = 16 MiB)
        ),
        cost_estimate=pl.CostEstimate(
            flops=flops, transcendentals=0, bytes_accessed=bytes_accessed),
    )(x_bf, w1_bf, b1, w2_bf, b2, w3_bf, b3)

    # Slice away batch padding and lane padding.
    return out[:batch, :out_dim]


def init_brain_params(key, in_dim, hidden_dim, out_dim):
    """Deterministic init mimicking PyTorch nn.Linear (uniform +/- 1/sqrt(fan_in)).

    Weights are stored as [fan_in, fan_out] (transpose of PyTorch's layout) so
    the kernel can compute x @ W directly.
    """
    ks = jax.random.split(key, 6)

    def linear(kw, kb, fan_in, fan_out):
        bound = 1.0 / jnp.sqrt(jnp.float32(fan_in))
        w = jax.random.uniform(kw, (fan_in, fan_out), jnp.float32, -bound, bound)
        b = jax.random.uniform(kb, (1, fan_out), jnp.float32, -bound, bound)
        return w, b

    w1, b1 = linear(ks[0], ks[1], in_dim, hidden_dim)
    w2, b2 = linear(ks[2], ks[3], hidden_dim, hidden_dim)
    w3, b3 = linear(ks[4], ks[5], hidden_dim, out_dim)
    return (w1, b1, w2, b2, w3, b3)


def brain_forward_ref(x, params):
    """Pure-JAX reference mirroring the kernel's bf16-operand / f32-accumulate math."""
    w1, b1, w2, b2, w3, b3 = params

    def q(a):  # bf16 quantization of matmul operands, as done in the kernel
        return a.astype(jnp.bfloat16).astype(jnp.float32)

    h = jnp.maximum(jnp.dot(q(x), q(w1)) + b1, 0.0)
    h = jnp.maximum(jnp.dot(q(h), q(w2)) + b2, 0.0)
    return jnp.dot(q(h), q(w3)) + b3


if __name__ == "__main__":
    # Small shapes consistent with a DQN brain: state dim 4, hidden 32, 2 actions.
    batch, in_dim, hidden_dim, out_dim = 8, 4, 32, 2

    key = jax.random.PRNGKey(0)
    kp, kx, kx2 = jax.random.split(key, 3)
    params = init_brain_params(kp, in_dim, hidden_dim, out_dim)

    fwd = jax.jit(brain_forward)

    # --- small (gridless) path ---
    x = jax.random.normal(kx, (batch, in_dim), dtype=jnp.float32)
    out = jax.block_until_ready(fwd(x, params))
    ref = brain_forward_ref(x, params)
    assert out.shape == (batch, out_dim)
    assert jnp.allclose(out, ref, atol=1e-4, rtol=1e-4)

    # --- tiled + padded batch path (replay-batch sized) ---
    big_batch = 2500  # > _MAX_BATCH_TILE and not a multiple of it
    xb = jax.random.normal(kx2, (big_batch, in_dim), dtype=jnp.float32)
    outb = jax.block_until_ready(fwd(xb, params))
    refb = brain_forward_ref(xb, params)
    assert outb.shape == (big_batch, out_dim)
    assert jnp.allclose(outb, refb, atol=1e-4, rtol=1e-4)

    print("KERNEL_OK")
</pallas_src>

<mosaic_0001>
module attributes {stable_mosaic.version = 11 : i64} {
  func.func @brain_forward_kernel(%arg0: i32, %arg1: memref<8x4xbf16, #tpu.memory_space<vmem>>, %arg2: memref<4x32xbf16, #tpu.memory_space<vmem>>, %arg3: memref<1x32xf32, #tpu.memory_space<vmem>>, %arg4: memref<32x32xbf16, #tpu.memory_space<vmem>>, %arg5: memref<1x32xf32, #tpu.memory_space<vmem>>, %arg6: memref<32x128xbf16, #tpu.memory_space<vmem>>, %arg7: memref<1x128xf32, #tpu.memory_space<vmem>>, %arg8: memref<8x128xf32, #tpu.memory_space<vmem>>) attributes {dimension_semantics = [#tpu.dimension_semantics<parallel>], iteration_bounds = array<i64: 1>, scalar_prefetch = 0 : i64, scratch_operands = 0 : i64, tpu.core_type = #tpu.core_type<tc>, window_params = [{transform_indices = @transform_0, window_bounds = array<i64: 8, 4>}, {pipeline_mode = #tpu.pipeline_mode<synchronous>, transform_indices = @transform_1, window_bounds = array<i64: 4, 32>}, {pipeline_mode = #tpu.pipeline_mode<synchronous>, transform_indices = @transform_2, window_bounds = array<i64: 1, 32>}, {pipeline_mode = #tpu.pipeline_mode<synchronous>, transform_indices = @transform_3, window_bounds = array<i64: 32, 32>}, {pipeline_mode = #tpu.pipeline_mode<synchronous>, transform_indices = @transform_4, window_bounds = array<i64: 1, 32>}, {pipeline_mode = #tpu.pipeline_mode<synchronous>, transform_indices = @transform_5, window_bounds = array<i64: 32, 128>}, {pipeline_mode = #tpu.pipeline_mode<synchronous>, transform_indices = @transform_6, window_bounds = array<i64: 1, 128>}, {transform_indices = @transform_7, window_bounds = array<i64: 8, 128>}]} {
    %c0 = arith.constant 0 : index
    %c0_0 = arith.constant 0 : index
    %0 = vector.load %arg1[%c0, %c0_0] : memref<8x4xbf16, #tpu.memory_space<vmem>>, vector<8x4xbf16>
    %c0_1 = arith.constant 0 : index
    %c0_2 = arith.constant 0 : index
    %1 = vector.load %arg2[%c0_1, %c0_2] : memref<4x32xbf16, #tpu.memory_space<vmem>>, vector<4x32xbf16>
    %cst = arith.constant dense<0.000000e+00> : vector<8x32xf32>
    %2 = tpu.matmul %0, %1, %cst {dimension_numbers = #tpu.dot_dimension_numbers<[1], [0], [0], [1], [0, 0, 1, 1], [], []>} : vector<8x4xbf16>, vector<4x32xbf16>, vector<8x32xf32> -> vector<8x32xf32>
    %c0_3 = arith.constant 0 : index
    %c0_4 = arith.constant 0 : index
    %3 = vector.load %arg3[%c0_3, %c0_4] : memref<1x32xf32, #tpu.memory_space<vmem>>, vector<1x32xf32>
    %4 = vector.broadcast %3 : vector<1x32xf32> to vector<8x32xf32>
    %5 = arith.addf %2, %4 : vector<8x32xf32>
    %cst_5 = arith.constant 0.000000e+00 : f32
    %6 = vector.broadcast %cst_5 : f32 to vector<8x32xf32>
    %7 = arith.maximumf %5, %6 : vector<8x32xf32>
    %8 = arith.truncf %7 : vector<8x32xf32> to vector<8x32xbf16>
    %c0_6 = arith.constant 0 : index
    %c0_7 = arith.constant 0 : index
    %9 = vector.load %arg4[%c0_6, %c0_7] : memref<32x32xbf16, #tpu.memory_space<vmem>>, vector<32x32xbf16>
    %cst_8 = arith.constant dense<0.000000e+00> : vector<8x32xf32>
    %10 = tpu.matmul %8, %9, %cst_8 {dimension_numbers = #tpu.dot_dimension_numbers<[1], [0], [0], [1], [0, 0, 1, 1], [], []>} : vector<8x32xbf16>, vector<32x32xbf16>, vector<8x32xf32> -> vector<8x32xf32>
    %c0_9 = arith.constant 0 : index
    %c0_10 = arith.constant 0 : index
    %11 = vector.load %arg5[%c0_9, %c0_10] : memref<1x32xf32, #tpu.memory_space<vmem>>, vector<1x32xf32>
    %12 = vector.broadcast %11 : vector<1x32xf32> to vector<8x32xf32>
    %13 = arith.addf %10, %12 : vector<8x32xf32>
    %cst_11 = arith.constant 0.000000e+00 : f32
    %14 = vector.broadcast %cst_11 : f32 to vector<8x32xf32>
    %15 = arith.maximumf %13, %14 : vector<8x32xf32>
    %16 = arith.truncf %15 : vector<8x32xf32> to vector<8x32xbf16>
    %c0_12 = arith.constant 0 : index
    %c0_13 = arith.constant 0 : index
    %17 = vector.load %arg6[%c0_12, %c0_13] : memref<32x128xbf16, #tpu.memory_space<vmem>>, vector<32x128xbf16>
    %cst_14 = arith.constant dense<0.000000e+00> : vector<8x128xf32>
    %18 = tpu.matmul %16, %17, %cst_14 {dimension_numbers = #tpu.dot_dimension_numbers<[1], [0], [0], [1], [0, 0, 1, 1], [], []>} : vector<8x32xbf16>, vector<32x128xbf16>, vector<8x128xf32> -> vector<8x128xf32>
    %c0_15 = arith.constant 0 : index
    %c0_16 = arith.constant 0 : index
    %19 = vector.load %arg7[%c0_15, %c0_16] : memref<1x128xf32, #tpu.memory_space<vmem>>, vector<1x128xf32>
    %20 = vector.broadcast %19 : vector<1x128xf32> to vector<8x128xf32>
    %21 = arith.addf %18, %20 : vector<8x128xf32>
    %c0_17 = arith.constant 0 : index
    %c0_18 = arith.constant 0 : index
    %22 = vector.load %arg8[%c0_17, %c0_18] : memref<8x128xf32, #tpu.memory_space<vmem>>, vector<8x128xf32>
    tpu.vector_store %arg8[%c0_17, %c0_18], %21 {strides = array<i32>} : memref<8x128xf32, #tpu.memory_space<vmem>>, vector<8x128xf32>,
    return
  }
  func.func @transform_0(%arg0: i32) -> (i32, i32) {
    %c0_i32 = arith.constant 0 : i32
    %c0_i32_0 = arith.constant 0 : i32
    return %arg0, %c0_i32 : i32, i32
  }
  func.func @transform_1(%arg0: i32) -> (i32, i32) {
    %c0_i32 = arith.constant 0 : i32
    %c0_i32_0 = arith.constant 0 : i32
    %c0_i32_1 = arith.constant 0 : i32
    return %c0_i32, %c0_i32_0 : i32, i32
  }
  func.func @transform_2(%arg0: i32) -> (i32, i32) {
    %c0_i32 = arith.constant 0 : i32
    %c0_i32_0 = arith.constant 0 : i32
    %c0_i32_1 = arith.constant 0 : i32
    return %c0_i32, %c0_i32_0 : i32, i32
  }
  func.func @transform_3(%arg0: i32) -> (i32, i32) {
    %c0_i32 = arith.constant 0 : i32
    %c0_i32_0 = arith.constant 0 : i32
    %c0_i32_1 = arith.constant 0 : i32
    return %c0_i32, %c0_i32_0 : i32, i32
  }
  func.func @transform_4(%arg0: i32) -> (i32, i32) {
    %c0_i32 = arith.constant 0 : i32
    %c0_i32_0 = arith.constant 0 : i32
    %c0_i32_1 = arith.constant 0 : i32
    return %c0_i32, %c0_i32_0 : i32, i32
  }
  func.func @transform_5(%arg0: i32) -> (i32, i32) {
    %c0_i32 = arith.constant 0 : i32
    %c0_i32_0 = arith.constant 0 : i32
    %c0_i32_1 = arith.constant 0 : i32
    return %c0_i32, %c0_i32_0 : i32, i32
  }
  func.func @transform_6(%arg0: i32) -> (i32, i32) {
    %c0_i32 = arith.constant 0 : i32
    %c0_i32_0 = arith.constant 0 : i32
    %c0_i32_1 = arith.constant 0 : i32
    return %c0_i32, %c0_i32_0 : i32, i32
  }
  func.func @transform_7(%arg0: i32) -> (i32, i32) {
    %c0_i32 = arith.constant 0 : i32
    %c0_i32_0 = arith.constant 0 : i32
    return %arg0, %c0_i32 : i32, i32
  }
}

</mosaic_0001>

<bundles_post_ra>
// kernel: brain_forward.1
= control target key start
LH: loop header
LB: loop body
LE: loop exit
PB: predicated region body
PF: predicated region fallthrough
CT: control target
= control target key end

     0   :  { %vm40_vm0 = vcmask 1041408   ;;  %v272_v0 = vmov 0.0   ;;  %vm273_vm1 = vmmov 0   ;;  %vm36_vm2 = vcmask 31744   ;;  %s344_s1 = inlined_call_operand.vmem [shape: bf16[4,32], index: 1, kind: input, shape index: {}]   ;;  %s345_s0 = inlined_call_operand.vmem [shape: bf16[8,4], index: 0, kind: input, shape index: {}]   ;;  %s346_s3 = inlined_call_operand.vmem [shape: bf16[32,32], index: 3, kind: input, shape index: {}]   ;;  %s347_s5 = inlined_call_operand.vmem [shape: bf16[32,128], index: 5, kind: input, shape index: {}]   ;;  %s348_s2 = inlined_call_operand.vmem [shape: f32[1,32], index: 2, kind: input, shape index: {}]   ;;  %s349_s4 = inlined_call_operand.vmem [shape: f32[1,32], index: 4, kind: input, shape index: {}]   ;;  %s350_s6 = inlined_call_operand.vmem [shape: f32[1,128], index: 6, kind: input, shape index: {}]   ;;  %s351_s7 = inlined_call_operand.vmem [shape: f32[8,128], index: 7, kind: output, shape index: {}]  }
   0x1   :  { %244 = vmatprep.subr.bf16.mxu0 %v272_v0  ;;  %v28_v1 = vld [vmem:[%s344_s1] sm:$0x3]  ;;  %246 = vmatprep.mubr.msk.bf16.mxu0 %vm273_vm1, %v272_v0  ;;  %v269_v5 = vld [vmem:[%s346_s3 + $0x8] sm:$0xff]   ;;  %vm109_vm3 = vcmask 261120  }
   0x2   :  { %v42_v2 = vsel %vm40_vm0, %v28_v1, 0  ;;  %250 = vmatprep.subr.bf16.mxu1 %v272_v0  ;;  %254 = vmatprep.mubr.msk.bf16.mxu1 %vm273_vm1, %v272_v0  ;;  %v27_v3 = vld [vmem:[%s345_s0] sm:$0xf]  ;;  %v271_v15 = vld [vmem:[%s347_s5 + $0x8] sm:$0xff]  }
   0x3   :  { %245 = vmatpush3.bf16.msra.mxu0 %v42_v2  ;;  %v268_v4 = vld [vmem:[%s346_s3] sm:$0xff]  }
   0x4   :  { %258 = vmatprep.subr.bf16.mxu0 %v272_v0  ;;  %251 = vmatpush3.bf16.msra.mxu1 %v268_v4  ;;  %v270_v6 = vld [vmem:[%s347_s5] sm:$0xff]  }
   0x5   :  { %252 = vmatprep.subr.bf16.mxu1 %v272_v0  ;;  %v226_v7 = vld [vmem:[%s348_s2] ss:$0 sm:$0xff] }
   0x6   :  { %247 = vmatmul.mubr.msk.bf16.vlgmr.msra.gmra.mrb[0].mxu0 %vm36_vm2, %v27_v3  ;;  %v228_v16 = vld [vmem:[%s349_s4] ss:$0 sm:$0xff] }
   0x7   :  { %262 = vmatprep.mubr.msk.bf16.mxu0 %vm273_vm1, %v272_v0  ;;  %259 = vmatpush3.bf16.msra.mxu0 %v270_v6  ;;  %v232_v24 = vld [vmem:[%s350_s6] ss:$0 sm:$0xff] }
   0x8   :  { %253 = vmatpush3.bf16.msra.mxu1 %v269_v5  ;;  %260 = vmatprep.subr.bf16.mxu0 %v272_v0 }
   0xb   :  { %261 = vmatpush3.bf16.msra.mxu0 %v271_v15 }
  0xd9   :  { %v78_v8 = vpop.f32.mrb[0].mxu0 }
  0xda   :  { %v79_v9 = vadd.f32 %v226_v7, %v78_v8  ;;  %v248_v10 = vpop.f32.mrb[1].mxu0 }
  0xdb   :  { %v81_v11 = vpop.f32.mrb[2].mxu0 }
  0xdc   :  { %v84_v12 = vmax.f32 %v79_v9, 0.0  ;;  %v249_v13 = vpop.f32.mrb[3].mxu0 }
  0xde   :  { %v85_v14 = vpack.c.bf16 %v84_v12, %v84_v12 }
  0xe0   :  { %255 = vmatmul.mubr.msk.bf16.vlgmr.msra.gmra.mrb[0].mxu1 %vm109_vm3, %v85_v14 }
 0x1b3   :  { %v147_v17 = vpop.f32.mrb[0].mxu1 }
 0x1b4   :  { %v148_v18 = vadd.f32 %v228_v16, %v147_v17  ;;  %v256_v19 = vpop.f32.mrb[1].mxu1 }
 0x1b5   :  { %v150_v20 = vpop.f32.mrb[2].mxu1 }
 0x1b6   :  { %v153_v21 = vmax.f32 %v148_v18, 0.0  ;;  %v257_v22 = vpop.f32.mrb[3].mxu1 }
 0x1b8   :  { %v154_v23 = vpack.c.bf16 %v153_v21, %v153_v21 }
 0x1ba   :  { %263 = vmatmul.mubr.msk.bf16.vlgmr.msra.gmra.mrb[4].mxu0 %vm109_vm3, %v154_v23 }
 0x28d   :  { %v215_v25 = vpop.f32.mrb[4].mxu0 }
 0x28e   :  { %v216_v26 = vadd.f32 %v232_v24, %v215_v25  ;;  %v264_v27 = vpop.f32.mrb[5].mxu0 }
 0x28f   :  { %v218_v28 = vpop.f32.mrb[6].mxu0 }
 0x290   :  { %221 = vst [vmem:[%s351_s7] sm:$0xff] %v216_v26  ;;  %v265_v29 = vpop.f32.mrb[7].mxu0 }

</bundles_post_ra>
